<compile_context>
chip_gen: v6e
topology: v6e:2x2x1
jax: 0.10.0
libtpu: 0.0.40
codegen_flags: <defaults>
</compile_context>

<pallas_src>
import math

import jax
import jax.numpy as jnp
import numpy as np
from jax.experimental import pallas as pl
from jax.experimental.pallas import tpu as pltpu

LANE = 128
SUBLANE = 8


def _round_up(v, m):
    return ((v + m - 1) // m) * m


# --------------------------------------------------------------------------- #
# Kernel: one fused 3-layer MLP step over a (BB, Np) row block.
# --------------------------------------------------------------------------- #
def clustering_encode_kernel(x_ref, w1_ref, b1_ref, w2_ref, b2_ref,
                             w3_ref, b3_ref, out_ref):
    x = x_ref[...]                                                     # (BB, Np) bf16

    # hidden1: Linear + ReLU   (bf16 MXU operands, f32 accumulation)
    h1 = jnp.dot(x, w1_ref[...], preferred_element_type=jnp.float32) + b1_ref[...]
    h1 = jnp.maximum(h1, 0.0)                                          # (BB, Hp) f32

    # hidden2: Linear + ReLU
    h2 = jnp.dot(h1.astype(jnp.bfloat16), w2_ref[...],
                 preferred_element_type=jnp.float32) + b2_ref[...]
    h2 = jnp.maximum(h2, 0.0)                                          # (BB, Hp) f32

    # hidden3: Linear + numerically stable Sigmoid (exp on the EUP slot)
    z = jnp.dot(h2.astype(jnp.bfloat16), w3_ref[...],
                preferred_element_type=jnp.float32) + b3_ref[...]      # (BB, Np) f32
    ez = jnp.exp(-jnp.abs(z))
    sig = jnp.where(z >= 0.0, 1.0 / (1.0 + ez), ez / (1.0 + ez))
    out_ref[...] = sig.astype(out_ref.dtype)


# --------------------------------------------------------------------------- #
# Block-row selection: big blocks to amortize per-step overhead, capped so the
# double-buffered tiles stay well inside v7x's 64 MiB VMEM, and split into
# >= 2 blocks (when the batch allows) so v7x can use both TensorCores.
# --------------------------------------------------------------------------- #
def _pick_block_rows(R, Np):
    per_row_bytes = 2 * (Np * 2) + 2 * (Np * 4)      # 2x bf16 x-tile + 2x f32 out-tile
    budget = 24 << 20                                # leave headroom under 64 MiB VMEM
    bb = max(SUBLANE, min(4096, budget // per_row_bytes))
    bb = (bb // SUBLANE) * SUBLANE
    if R >= 2 * SUBLANE:
        bb = min(bb, _round_up(pl.cdiv(R, 2), SUBLANE))   # >= 2 parallel row blocks
    return max(SUBLANE, min(bb, _round_up(R, SUBLANE)))


# --------------------------------------------------------------------------- #
# Wrapper
# --------------------------------------------------------------------------- #
def clustering_encode(x, params):
    """Run the fused 3-layer MLP. `x` may have any leading dims; last dim = node_num."""
    orig_shape = x.shape
    N = orig_shape[-1]
    H = params["w1"].shape[1]
    Np = _round_up(N, LANE)
    Hp = _round_up(H, LANE)

    x2 = x.reshape(-1, N).astype(jnp.float32)
    R = x2.shape[0]

    # Zero-pad everything to lane-dense (multiples of 128) shapes.
    def pad2(a, rows, cols):
        return jnp.pad(a, ((0, rows - a.shape[0]), (0, cols - a.shape[1])))

    xp = pad2(x2, R, Np).astype(jnp.bfloat16)
    w1 = pad2(params["w1"], Np, Hp).astype(jnp.bfloat16)
    w2 = pad2(params["w2"], Hp, Hp).astype(jnp.bfloat16)
    w3 = pad2(params["w3"], Hp, Np).astype(jnp.bfloat16)
    b1 = pad2(params["b1"], 1, Hp).astype(jnp.float32)
    b2 = pad2(params["b2"], 1, Hp).astype(jnp.float32)
    b3 = pad2(params["b3"], 1, Np).astype(jnp.float32)

    BB = _pick_block_rows(R, Np)
    grid = (pl.cdiv(R, BB),)

    def vmem_limit(weight_bufs):
        tiles = 2 * BB * Np * 2 + 2 * BB * Np * 4                     # x + out tiles
        weights = weight_bufs * ((Np * Hp + Hp * Hp + Hp * Np) * 2
                                 + (2 * Hp + Np) * 4)
        interm = 3 * BB * Hp * 4                                       # h1 / h2 / z
        est = tiles + weights + interm
        return int(min(56 << 20, max(16 << 20, 2 * est)))

    cost = pl.CostEstimate(
        flops=2 * R * (Np * Hp + Hp * Hp + Hp * Np),
        transcendentals=R * Np,
        bytes_accessed=(xp.size * 2 + (w1.size + w2.size + w3.size) * 2
                        + (b1.size + b2.size + b3.size) * 4 + R * Np * 4),
    )

    def run(weight_mode, weight_bufs):
        if weight_mode is None:
            def const_spec(shape):
                return pl.BlockSpec(shape, lambda i: (0, 0))
        else:
            def const_spec(shape):
                return pl.BlockSpec(shape, lambda i: (0, 0), pipeline_mode=weight_mode)

        f = pl.pallas_call(
            clustering_encode_kernel,
            out_shape=jax.ShapeDtypeStruct((R, Np), jnp.float32),
            grid=grid,
            in_specs=[
                pl.BlockSpec((BB, Np), lambda i: (i, 0)),   # x row block
                const_spec((Np, Hp)),                       # W1 (pre-transposed)
                const_spec((1, Hp)),                        # b1
                const_spec((Hp, Hp)),                       # W2
                const_spec((1, Hp)),                        # b2
                const_spec((Hp, Np)),                       # W3
                const_spec((1, Np)),                        # b3
            ],
            out_specs=pl.BlockSpec((BB, Np), lambda i: (i, 0)),
            compiler_params=pltpu.CompilerParams(
                dimension_semantics=("parallel",),
                vmem_limit_bytes=vmem_limit(weight_bufs)),
            cost_estimate=cost,
        )
        return f(xp, w1, b1, w2, b2, w3, b3)

    try:
        # Constant operands single-buffered: they are revisited every step, so a
        # second buffer only wastes VMEM (matters for large node_num on v7x).
        out = run(pl.Buffered(1), 1)
    except Exception:
        # Fallback for jax versions without BlockSpec pipeline_mode support.
        out = run(None, 2)

    out = out[:, :N]                                        # drop padded output lanes
    return out.reshape(orig_shape[:-1] + (N,))


# --------------------------------------------------------------------------- #
# References (for verification)
# --------------------------------------------------------------------------- #
def reference_clustering_encode(x, params):
    """Pure-JAX f32 replica of the PyTorch forward pass."""
    h1 = jax.nn.relu(x @ params["w1"] + params["b1"][0])
    h2 = jax.nn.relu(h1 @ params["w2"] + params["b2"][0])
    return jax.nn.sigmoid(h2 @ params["w3"] + params["b3"][0])


def reference_bf16_matched(x, params):
    """Reference with the same bf16-operand / f32-accumulation scheme as the kernel."""
    b16 = jnp.bfloat16
    h1 = jax.nn.relu(jnp.dot(x.astype(b16), params["w1"].astype(b16),
                             preferred_element_type=jnp.float32) + params["b1"][0])
    h2 = jax.nn.relu(jnp.dot(h1.astype(b16), params["w2"].astype(b16),
                             preferred_element_type=jnp.float32) + params["b2"][0])
    z = jnp.dot(h2.astype(b16), params["w3"].astype(b16),
                preferred_element_type=jnp.float32) + params["b3"][0]
    return jax.nn.sigmoid(z)


def init_params(key, node_num, hidden=100):
    """PyTorch-style uniform(-1/sqrt(fan_in), 1/sqrt(fan_in)) init, weights pre-transposed."""
    ks = jax.random.split(key, 6)

    def unif(k, shape, fan_in):
        lim = 1.0 / math.sqrt(fan_in)
        return jax.random.uniform(k, shape, jnp.float32, -lim, lim)

    return dict(
        w1=unif(ks[0], (node_num, hidden), node_num),
        b1=unif(ks[1], (1, hidden), node_num),
        w2=unif(ks[2], (hidden, hidden), hidden),
        b2=unif(ks[3], (1, hidden), hidden),
        w3=unif(ks[4], (hidden, node_num), hidden),
        b3=unif(ks[5], (1, node_num), hidden),
    )


if __name__ == "__main__":
    node_num, hidden, batch = 32, 100, 8

    key = jax.random.PRNGKey(0)
    kx, kp = jax.random.split(key)
    x = jax.random.normal(kx, (batch, node_num), jnp.float32)
    params = init_params(kp, node_num, hidden)

    out = jax.block_until_ready(clustering_encode(x, params))

    # Tight check against a bf16-operand-matched reference.
    ref16 = reference_bf16_matched(x, params)
    np.testing.assert_allclose(np.asarray(out), np.asarray(ref16), rtol=5e-3, atol=2e-3)

    # Looser semantic check against the full-f32 PyTorch-equivalent forward.
    ref32 = reference_clustering_encode(x, params)
    np.testing.assert_allclose(np.asarray(out), np.asarray(ref32), rtol=5e-2, atol=3e-2)

    print("KERNEL_OK")
</pallas_src>

<mosaic_0001>
module attributes {stable_mosaic.version = 11 : i64} {
  func.func @clustering_encode_kernel(%arg0: i32, %arg1: memref<8x128xbf16, #tpu.memory_space<vmem>>, %arg2: memref<128x128xbf16, #tpu.memory_space<vmem>>, %arg3: memref<1x128xf32, #tpu.memory_space<vmem>>, %arg4: memref<128x128xbf16, #tpu.memory_space<vmem>>, %arg5: memref<1x128xf32, #tpu.memory_space<vmem>>, %arg6: memref<128x128xbf16, #tpu.memory_space<vmem>>, %arg7: memref<1x128xf32, #tpu.memory_space<vmem>>, %arg8: memref<8x128xf32, #tpu.memory_space<vmem>>) attributes {dimension_semantics = [#tpu.dimension_semantics<parallel>], iteration_bounds = array<i64: 1>, scalar_prefetch = 0 : i64, scratch_operands = 0 : i64, tpu.core_type = #tpu.core_type<tc>, window_params = [{transform_indices = @transform_0, window_bounds = array<i64: 8, 128>}, {pipeline_mode = #tpu.pipeline_mode<synchronous>, transform_indices = @transform_1, window_bounds = array<i64: 128, 128>}, {pipeline_mode = #tpu.pipeline_mode<synchronous>, transform_indices = @transform_2, window_bounds = array<i64: 1, 128>}, {pipeline_mode = #tpu.pipeline_mode<synchronous>, transform_indices = @transform_3, window_bounds = array<i64: 128, 128>}, {pipeline_mode = #tpu.pipeline_mode<synchronous>, transform_indices = @transform_4, window_bounds = array<i64: 1, 128>}, {pipeline_mode = #tpu.pipeline_mode<synchronous>, transform_indices = @transform_5, window_bounds = array<i64: 128, 128>}, {pipeline_mode = #tpu.pipeline_mode<synchronous>, transform_indices = @transform_6, window_bounds = array<i64: 1, 128>}, {transform_indices = @transform_7, window_bounds = array<i64: 8, 128>}]} {
    %c0 = arith.constant 0 : index
    %c0_0 = arith.constant 0 : index
    %0 = vector.load %arg1[%c0, %c0_0] : memref<8x128xbf16, #tpu.memory_space<vmem>>, vector<8x128xbf16>
    %c0_1 = arith.constant 0 : index
    %c0_2 = arith.constant 0 : index
    %1 = vector.load %arg2[%c0_1, %c0_2] : memref<128x128xbf16, #tpu.memory_space<vmem>>, vector<128x128xbf16>
    %cst = arith.constant dense<0.000000e+00> : vector<8x128xf32>
    %2 = tpu.matmul %0, %1, %cst {dimension_numbers = #tpu.dot_dimension_numbers<[1], [0], [0], [1], [0, 0, 1, 1], [], []>} : vector<8x128xbf16>, vector<128x128xbf16>, vector<8x128xf32> -> vector<8x128xf32>
    %c0_3 = arith.constant 0 : index
    %c0_4 = arith.constant 0 : index
    %3 = vector.load %arg3[%c0_3, %c0_4] : memref<1x128xf32, #tpu.memory_space<vmem>>, vector<1x128xf32>
    %4 = vector.broadcast %3 : vector<1x128xf32> to vector<8x128xf32>
    %5 = arith.addf %2, %4 : vector<8x128xf32>
    %cst_5 = arith.constant 0.000000e+00 : f32
    %6 = vector.broadcast %cst_5 : f32 to vector<8x128xf32>
    %7 = arith.maximumf %5, %6 : vector<8x128xf32>
    %8 = arith.truncf %7 : vector<8x128xf32> to vector<8x128xbf16>
    %c0_6 = arith.constant 0 : index
    %c0_7 = arith.constant 0 : index
    %9 = vector.load %arg4[%c0_6, %c0_7] : memref<128x128xbf16, #tpu.memory_space<vmem>>, vector<128x128xbf16>
    %cst_8 = arith.constant dense<0.000000e+00> : vector<8x128xf32>
    %10 = tpu.matmul %8, %9, %cst_8 {dimension_numbers = #tpu.dot_dimension_numbers<[1], [0], [0], [1], [0, 0, 1, 1], [], []>} : vector<8x128xbf16>, vector<128x128xbf16>, vector<8x128xf32> -> vector<8x128xf32>
    %c0_9 = arith.constant 0 : index
    %c0_10 = arith.constant 0 : index
    %11 = vector.load %arg5[%c0_9, %c0_10] : memref<1x128xf32, #tpu.memory_space<vmem>>, vector<1x128xf32>
    %12 = vector.broadcast %11 : vector<1x128xf32> to vector<8x128xf32>
    %13 = arith.addf %10, %12 : vector<8x128xf32>
    %cst_11 = arith.constant 0.000000e+00 : f32
    %14 = vector.broadcast %cst_11 : f32 to vector<8x128xf32>
    %15 = arith.maximumf %13, %14 : vector<8x128xf32>
    %16 = arith.truncf %15 : vector<8x128xf32> to vector<8x128xbf16>
    %c0_12 = arith.constant 0 : index
    %c0_13 = arith.constant 0 : index
    %17 = vector.load %arg6[%c0_12, %c0_13] : memref<128x128xbf16, #tpu.memory_space<vmem>>, vector<128x128xbf16>
    %cst_14 = arith.constant dense<0.000000e+00> : vector<8x128xf32>
    %18 = tpu.matmul %16, %17, %cst_14 {dimension_numbers = #tpu.dot_dimension_numbers<[1], [0], [0], [1], [0, 0, 1, 1], [], []>} : vector<8x128xbf16>, vector<128x128xbf16>, vector<8x128xf32> -> vector<8x128xf32>
    %c0_15 = arith.constant 0 : index
    %c0_16 = arith.constant 0 : index
    %19 = vector.load %arg7[%c0_15, %c0_16] : memref<1x128xf32, #tpu.memory_space<vmem>>, vector<1x128xf32>
    %20 = vector.broadcast %19 : vector<1x128xf32> to vector<8x128xf32>
    %21 = arith.addf %18, %20 : vector<8x128xf32>
    %22 = math.absf %21 : vector<8x128xf32>
    %cst_17 = arith.constant 0.000000e+00 : f32
    %23 = vector.broadcast %cst_17 : f32 to vector<8x128xf32>
    %24 = arith.subf %23, %22 : vector<8x128xf32>
    %25 = math.exp %24 : vector<8x128xf32>
    %cst_18 = arith.constant 0.000000e+00 : f32
    %26 = vector.broadcast %cst_18 : f32 to vector<8x128xf32>
    %27 = arith.cmpf oge, %21, %26 : vector<8x128xf32>
    %cst_19 = arith.constant 1.000000e+00 : f32
    %28 = vector.broadcast %cst_19 : f32 to vector<8x128xf32>
    %29 = arith.addf %28, %25 : vector<8x128xf32>
    %cst_20 = arith.constant 1.000000e+00 : f32
    %30 = vector.broadcast %cst_20 : f32 to vector<8x128xf32>
    %31 = arith.divf %30, %29 : vector<8x128xf32>
    %cst_21 = arith.constant 1.000000e+00 : f32
    %32 = vector.broadcast %cst_21 : f32 to vector<8x128xf32>
    %33 = arith.addf %32, %25 : vector<8x128xf32>
    %34 = arith.divf %25, %33 : vector<8x128xf32>
    %35 = arith.select %27, %31, %34 : vector<8x128xi1>, vector<8x128xf32>
    %c0_22 = arith.constant 0 : index
    %c0_23 = arith.constant 0 : index
    %36 = vector.load %arg8[%c0_22, %c0_23] : memref<8x128xf32, #tpu.memory_space<vmem>>, vector<8x128xf32>
    tpu.vector_store %arg8[%c0_22, %c0_23], %35 {strides = array<i32>} : memref<8x128xf32, #tpu.memory_space<vmem>>, vector<8x128xf32>,
    return
  }
  func.func @transform_0(%arg0: i32) -> (i32, i32) {
    %c0_i32 = arith.constant 0 : i32
    %c0_i32_0 = arith.constant 0 : i32
    return %arg0, %c0_i32 : i32, i32
  }
  func.func @transform_1(%arg0: i32) -> (i32, i32) {
    %c0_i32 = arith.constant 0 : i32
    %c0_i32_0 = arith.constant 0 : i32
    %c0_i32_1 = arith.constant 0 : i32
    return %c0_i32, %c0_i32_0 : i32, i32
  }
  func.func @transform_2(%arg0: i32) -> (i32, i32) {
    %c0_i32 = arith.constant 0 : i32
    %c0_i32_0 = arith.constant 0 : i32
    %c0_i32_1 = arith.constant 0 : i32
    return %c0_i32, %c0_i32_0 : i32, i32
  }
  func.func @transform_3(%arg0: i32) -> (i32, i32) {
    %c0_i32 = arith.constant 0 : i32
    %c0_i32_0 = arith.constant 0 : i32
    %c0_i32_1 = arith.constant 0 : i32
    return %c0_i32, %c0_i32_0 : i32, i32
  }
  func.func @transform_4(%arg0: i32) -> (i32, i32) {
    %c0_i32 = arith.constant 0 : i32
    %c0_i32_0 = arith.constant 0 : i32
    %c0_i32_1 = arith.constant 0 : i32
    return %c0_i32, %c0_i32_0 : i32, i32
  }
  func.func @transform_5(%arg0: i32) -> (i32, i32) {
    %c0_i32 = arith.constant 0 : i32
    %c0_i32_0 = arith.constant 0 : i32
    %c0_i32_1 = arith.constant 0 : i32
    return %c0_i32, %c0_i32_0 : i32, i32
  }
  func.func @transform_6(%arg0: i32) -> (i32, i32) {
    %c0_i32 = arith.constant 0 : i32
    %c0_i32_0 = arith.constant 0 : i32
    %c0_i32_1 = arith.constant 0 : i32
    return %c0_i32, %c0_i32_0 : i32, i32
  }
  func.func @transform_7(%arg0: i32) -> (i32, i32) {
    %c0_i32 = arith.constant 0 : i32
    %c0_i32_0 = arith.constant 0 : i32
    return %arg0, %c0_i32 : i32, i32
  }
}

module attributes {stable_mosaic.version = 11 : i64} {
  func.func @clustering_encode_kernel(%arg0: i32, %arg1: memref<8x128xbf16, #tpu.memory_space<vmem>>, %arg2: memref<128x128xbf16, #tpu.memory_space<vmem>>, %arg3: memref<1x128xf32, #tpu.memory_space<vmem>>, %arg4: memref<128x128xbf16, #tpu.memory_space<vmem>>, %arg5: memref<1x128xf32, #tpu.memory_space<vmem>>, %arg6: memref<128x128xbf16, #tpu.memory_space<vmem>>, %arg7: memref<1x128xf32, #tpu.memory_space<vmem>>, %arg8: memref<8x128xf32, #tpu.memory_space<vmem>>) attributes {dimension_semantics = [#tpu.dimension_semantics<parallel>], iteration_bounds = array<i64: 1>, scalar_prefetch = 0 : i64, scratch_operands = 0 : i64, tpu.core_type = #tpu.core_type<tc>, window_params = [{transform_indices = @transform_0, window_bounds = array<i64: 8, 128>}, {pipeline_mode = #tpu.pipeline_mode<synchronous>, transform_indices = @transform_1, window_bounds = array<i64: 128, 128>}, {pipeline_mode = #tpu.pipeline_mode<synchronous>, transform_indices = @transform_2, window_bounds = array<i64: 1, 128>}, {pipeline_mode = #tpu.pipeline_mode<synchronous>, transform_indices = @transform_3, window_bounds = array<i64: 128, 128>}, {pipeline_mode = #tpu.pipeline_mode<synchronous>, transform_indices = @transform_4, window_bounds = array<i64: 1, 128>}, {pipeline_mode = #tpu.pipeline_mode<synchronous>, transform_indices = @transform_5, window_bounds = array<i64: 128, 128>}, {pipeline_mode = #tpu.pipeline_mode<synchronous>, transform_indices = @transform_6, window_bounds = array<i64: 1, 128>}, {transform_indices = @transform_7, window_bounds = array<i64: 8, 128>}]} {
    %c0 = arith.constant 0 : index
    %c0_0 = arith.constant 0 : index
    %0 = vector.load %arg1[%c0, %c0_0] : memref<8x128xbf16, #tpu.memory_space<vmem>>, vector<8x128xbf16>
    %c0_1 = arith.constant 0 : index
    %c0_2 = arith.constant 0 : index
    %1 = vector.load %arg2[%c0_1, %c0_2] : memref<128x128xbf16, #tpu.memory_space<vmem>>, vector<128x128xbf16>
    %cst = arith.constant dense<0.000000e+00> : vector<8x128xf32>
    %2 = tpu.matmul %0, %1, %cst {dimension_numbers = #tpu.dot_dimension_numbers<[1], [0], [0], [1], [0, 0, 1, 1], [], []>} : vector<8x128xbf16>, vector<128x128xbf16>, vector<8x128xf32> -> vector<8x128xf32>
    %c0_3 = arith.constant 0 : index
    %c0_4 = arith.constant 0 : index
    %3 = vector.load %arg3[%c0_3, %c0_4] : memref<1x128xf32, #tpu.memory_space<vmem>>, vector<1x128xf32>
    %4 = vector.broadcast %3 : vector<1x128xf32> to vector<8x128xf32>
    %5 = arith.addf %2, %4 : vector<8x128xf32>
    %cst_5 = arith.constant 0.000000e+00 : f32
    %6 = vector.broadcast %cst_5 : f32 to vector<8x128xf32>
    %7 = arith.maximumf %5, %6 : vector<8x128xf32>
    %8 = arith.truncf %7 : vector<8x128xf32> to vector<8x128xbf16>
    %c0_6 = arith.constant 0 : index
    %c0_7 = arith.constant 0 : index
    %9 = vector.load %arg4[%c0_6, %c0_7] : memref<128x128xbf16, #tpu.memory_space<vmem>>, vector<128x128xbf16>
    %cst_8 = arith.constant dense<0.000000e+00> : vector<8x128xf32>
    %10 = tpu.matmul %8, %9, %cst_8 {dimension_numbers = #tpu.dot_dimension_numbers<[1], [0], [0], [1], [0, 0, 1, 1], [], []>} : vector<8x128xbf16>, vector<128x128xbf16>, vector<8x128xf32> -> vector<8x128xf32>
    %c0_9 = arith.constant 0 : index
    %c0_10 = arith.constant 0 : index
    %11 = vector.load %arg5[%c0_9, %c0_10] : memref<1x128xf32, #tpu.memory_space<vmem>>, vector<1x128xf32>
    %12 = vector.broadcast %11 : vector<1x128xf32> to vector<8x128xf32>
    %13 = arith.addf %10, %12 : vector<8x128xf32>
    %cst_11 = arith.constant 0.000000e+00 : f32
    %14 = vector.broadcast %cst_11 : f32 to vector<8x128xf32>
    %15 = arith.maximumf %13, %14 : vector<8x128xf32>
    %16 = arith.truncf %15 : vector<8x128xf32> to vector<8x128xbf16>
    %c0_12 = arith.constant 0 : index
    %c0_13 = arith.constant 0 : index
    %17 = vector.load %arg6[%c0_12, %c0_13] : memref<128x128xbf16, #tpu.memory_space<vmem>>, vector<128x128xbf16>
    %cst_14 = arith.constant dense<0.000000e+00> : vector<8x128xf32>
    %18 = tpu.matmul %16, %17, %cst_14 {dimension_numbers = #tpu.dot_dimension_numbers<[1], [0], [0], [1], [0, 0, 1, 1], [], []>} : vector<8x128xbf16>, vector<128x128xbf16>, vector<8x128xf32> -> vector<8x128xf32>
    %c0_15 = arith.constant 0 : index
    %c0_16 = arith.constant 0 : index
    %19 = vector.load %arg7[%c0_15, %c0_16] : memref<1x128xf32, #tpu.memory_space<vmem>>, vector<1x128xf32>
    %20 = vector.broadcast %19 : vector<1x128xf32> to vector<8x128xf32>
    %21 = arith.addf %18, %20 : vector<8x128xf32>
    %22 = math.absf %21 : vector<8x128xf32>
    %cst_17 = arith.constant 0.000000e+00 : f32
    %23 = vector.broadcast %cst_17 : f32 to vector<8x128xf32>
    %24 = arith.subf %23, %22 : vector<8x128xf32>
    %25 = math.exp %24 : vector<8x128xf32>
    %cst_18 = arith.constant 0.000000e+00 : f32
    %26 = vector.broadcast %cst_18 : f32 to vector<8x128xf32>
    %27 = arith.cmpf oge, %21, %26 : vector<8x128xf32>
    %cst_19 = arith.constant 1.000000e+00 : f32
    %28 = vector.broadcast %cst_19 : f32 to vector<8x128xf32>
    %29 = arith.addf %28, %25 : vector<8x128xf32>
    %cst_20 = arith.constant 1.000000e+00 : f32
    %30 = vector.broadcast %cst_20 : f32 to vector<8x128xf32>
    %31 = arith.divf %30, %29 : vector<8x128xf32>
    %cst_21 = arith.constant 1.000000e+00 : f32
    %32 = vector.broadcast %cst_21 : f32 to vector<8x128xf32>
    %33 = arith.addf %32, %25 : vector<8x128xf32>
    %34 = arith.divf %25, %33 : vector<8x128xf32>
    %35 = arith.select %27, %31, %34 : vector<8x128xi1>, vector<8x128xf32>
    %c0_22 = arith.constant 0 : index
    %c0_23 = arith.constant 0 : index
    %36 = vector.load %arg8[%c0_22, %c0_23] : memref<8x128xf32, #tpu.memory_space<vmem>>, vector<8x128xf32>
    tpu.vector_store %arg8[%c0_22, %c0_23], %35 {strides = array<i32>} : memref<8x128xf32, #tpu.memory_space<vmem>>, vector<8x128xf32>,
    return
  }
  func.func @transform_0(%arg0: i32) -> (i32, i32) {
    %c0_i32 = arith.constant 0 : i32
    %c0_i32_0 = arith.constant 0 : i32
    return %arg0, %c0_i32 : i32, i32
  }
  func.func @transform_1(%arg0: i32) -> (i32, i32) {
    %c0_i32 = arith.constant 0 : i32
    %c0_i32_0 = arith.constant 0 : i32
    %c0_i32_1 = arith.constant 0 : i32
    return %c0_i32, %c0_i32_0 : i32, i32
  }
  func.func @transform_2(%arg0: i32) -> (i32, i32) {
    %c0_i32 = arith.constant 0 : i32
    %c0_i32_0 = arith.constant 0 : i32
    %c0_i32_1 = arith.constant 0 : i32
    return %c0_i32, %c0_i32_0 : i32, i32
  }
  func.func @transform_3(%arg0: i32) -> (i32, i32) {
    %c0_i32 = arith.constant 0 : i32
    %c0_i32_0 = arith.constant 0 : i32
    %c0_i32_1 = arith.constant 0 : i32
    return %c0_i32, %c0_i32_0 : i32, i32
  }
  func.func @transform_4(%arg0: i32) -> (i32, i32) {
    %c0_i32 = arith.constant 0 : i32
    %c0_i32_0 = arith.constant 0 : i32
    %c0_i32_1 = arith.constant 0 : i32
    return %c0_i32, %c0_i32_0 : i32, i32
  }
  func.func @transform_5(%arg0: i32) -> (i32, i32) {
    %c0_i32 = arith.constant 0 : i32
    %c0_i32_0 = arith.constant 0 : i32
    %c0_i32_1 = arith.constant 0 : i32
    return %c0_i32, %c0_i32_0 : i32, i32
  }
  func.func @transform_6(%arg0: i32) -> (i32, i32) {
    %c0_i32 = arith.constant 0 : i32
    %c0_i32_0 = arith.constant 0 : i32
    %c0_i32_1 = arith.constant 0 : i32
    return %c0_i32, %c0_i32_0 : i32, i32
  }
  func.func @transform_7(%arg0: i32) -> (i32, i32) {
    %c0_i32 = arith.constant 0 : i32
    %c0_i32_0 = arith.constant 0 : i32
    return %arg0, %c0_i32 : i32, i32
  }
}

</mosaic_0001>

<bundles_post_ra>
// kernel: tpu_custom_call.1
= control target key start
LH: loop header
LB: loop body
LE: loop exit
PB: predicated region body
PF: predicated region fallthrough
CT: control target
= control target key end

     0   :  { %12 = vsyncpa [#allocation3], 0  ;;  %s818_s0 = inlined_call_operand.hbm [shape: bf16[8,128], index: 0, kind: input, shape index: {}]   ;;  %s819_s1 = inlined_call_operand.hbm [shape: bf16[128,128], index: 1, kind: input, shape index: {}]   ;;  %s820_s2 = inlined_call_operand.vmem [shape: f32[1,128], index: 2, kind: input, shape index: {}]   ;;  %s821_s3 = inlined_call_operand.hbm [shape: bf16[128,128], index: 3, kind: input, shape index: {}]   ;;  %s822_s4 = inlined_call_operand.vmem [shape: f32[1,128], index: 4, kind: input, shape index: {}]   ;;  %s823_s5 = inlined_call_operand.hbm [shape: bf16[128,128], index: 5, kind: input, shape index: {}]   ;;  %s824_s6 = inlined_call_operand.vmem [shape: f32[1,128], index: 6, kind: input, shape index: {}]   ;;  %s825_s7 = inlined_call_operand.hbm [shape: f32[8,128], index: 7, kind: output, shape index: {}]  }
   0x1   :  { %13 = vsyncpa [#allocation6], 0 }
   0x2   :  { %14 = vsyncpa [#allocation9], 0 }
   0x3   :  { %15 = vsyncpa [#allocation4], 0  ;;  %s706_s24 = smov [#allocation5]  }
   0x4   :  { %s31_s25 = sshll.u32 %s706_s24, 4  ;;  %s32_s25 = int_to_ptr.vmem [resolvable:$true] %s31_s25 }
   0x5   :  { %s606_s26 = scalar_lea.vmem %s32_s25, 1024  ;;  %p611_p1 = scmp.lt.s32.totalorder %s32_s25, %s32_s25 }
   0x6   :  { %p607_p0 = scmp.ne.s32.totalorder %s32_s25, %s606_s26  ;;  %p612_p2 = scmp.lt.s32.totalorder %s606_s26, %s606_s26 }
   0x8   :  { %p613_p3 = por %p612_p2, %p611_p1 }
   0xa   :  { %p614_p4 = pnand %p613_p3, %p607_p0 }
   0xc   :  { %617 = shalt.err (!%p614_p4)
}
   0xd   :  { %s707_s27 = smov 64   ;;  %s708_s28 = smov 4  }
   0xe   :  { %37 = dma.hbm_to_vmem [thread:$0]  %s819_s1, 1024, %s32_s25, [#allocation6], %s707_s27, %s707_s27, %s708_s28  }
   0xf   :  { %s709_s8 = smov [#allocation2]   ;;  %s710_s10 = smov [#allocation7]  }
  0x10   :  { %s22_s9 = sshll.u32 %s709_s8, 4  ;;  %s45_s11 = sshll.u32 %s710_s10, 4  ;;  %s23_s9 = int_to_ptr.vmem [resolvable:$true] %s22_s9  ;;  %s46_s11 = int_to_ptr.vmem [resolvable:$true] %s45_s11 }
  0x11   :  { %s626_s12 = scalar_lea.vmem %s23_s9, 64  ;;  %p631_p6 = scmp.lt.s32.totalorder %s23_s9, %s23_s9 }
  0x12   :  { %p627_p5 = scmp.ne.s32.totalorder %s23_s9, %s626_s12  ;;  %p632_p7 = scmp.lt.s32.totalorder %s626_s12, %s626_s12 }
  0x14   :  { %p633_p8 = por %p632_p7, %p631_p6 }
  0x16   :  { %p634_p9 = pnand %p633_p8, %p627_p5 }
  0x18   :  { %637 = shalt.err (!%p634_p9)
}
  0x19   :  { %25 = dma.hbm_to_vmem [thread:$0]  %s818_s0, 64, %s23_s9, [#allocation3]  }
  0x1a   :  { %s646_s15 = scalar_lea.vmem %s46_s11, 1024  ;;  %p651_p11 = scmp.lt.s32.totalorder %s46_s11, %s46_s11 }
  0x1b   :  { %p647_p10 = scmp.ne.s32.totalorder %s46_s11, %s646_s15  ;;  %p652_p12 = scmp.lt.s32.totalorder %s646_s15, %s646_s15 }
  0x1d   :  { %p653_p13 = por %p652_p12, %p651_p11 }
  0x1f   :  { %p654_p0 = pnand %p653_p13, %p647_p10 }
  0x21   :  { %657 = shalt.err (!%p654_p0)
}
  0x22   :  { %51 = dma.hbm_to_vmem [thread:$0]  %s821_s3, 1024, %s46_s11, [#allocation6], %s707_s27, %s707_s27, %s708_s28  }
  0x23   :  { %s711_s17 = smov [#allocation8]  }
  0x24   :  { %s59_s18 = sshll.u32 %s711_s17, 4  ;;  %s60_s18 = int_to_ptr.vmem [resolvable:$true] %s59_s18 }
  0x25   :  { %s666_s19 = scalar_lea.vmem %s60_s18, 1024  ;;  %p671_p2 = scmp.lt.s32.totalorder %s60_s18, %s60_s18 }
  0x26   :  { %p667_p1 = scmp.ne.s32.totalorder %s60_s18, %s666_s19  ;;  %p672_p3 = scmp.lt.s32.totalorder %s666_s19, %s666_s19 }
  0x28   :  { %p673_p4 = por %p672_p3, %p671_p2 }
  0x2a   :  { %p674_p5 = pnand %p673_p4, %p667_p1 }
  0x2c   :  { %677 = shalt.err (!%p674_p5)
}
  0x2d   :  { %65 = dma.hbm_to_vmem [thread:$0]  %s823_s5, 1024, %s60_s18, [#allocation9], %s707_s27, %s707_s27, %s708_s28  }
  0x2e   :  { %698 = dma.done.wait [#allocation3], 64  }
  0x2f   :  { %699 = vsyncadd [#allocation3], 4294967232 }
  0x30   :  { %700 = dma.done.wait [#allocation6], 2048  }
  0x31   :  { %701 = vsyncadd [#allocation6], 4294965248 }
  0x32   :  { %702 = dma.done.wait [#allocation9], 1024  }
  0x33   :  { %703 = vsyncadd [#allocation9], 4294966272  ;;  %v712_v0 = vmov 0.0   ;;  %vm713_vm0 = vmmov 0   ;;  %v570_v1 = vld [vmem:[#allocation5 + $0x38] sm:$0xff]   ;;  %v571_v2 = vld [vmem:[#allocation5 + $0x30] sm:$0xff]  }
  0x34   :  { %501 = vmatprep.subr.bf16.mxu0 %v712_v0  ;;  %517 = vmatprep.mubr.msk.bf16.mxu0 %vm713_vm0, %v712_v0  ;;  %v572_v3 = vld [vmem:[#allocation5 + $0x28] sm:$0xff]   ;;  %v578_v4 = vld [vmem:[#allocation7 + $0x38] sm:$0xff]   ;;  %v573_v5 = vld [vmem:[#allocation5 + $0x20] sm:$0xff]  }
  0x35   :  { %521 = vmatprep.subr.bf16.mxu1 %v712_v0  ;;  %537 = vmatprep.mubr.msk.bf16.mxu1 %vm713_vm0, %v712_v0  ;;  %v579_v6 = vld [vmem:[#allocation7 + $0x30] sm:$0xff]   ;;  %v574_v7 = vld [vmem:[#allocation5 + $0x18] sm:$0xff]   ;;  %v580_v8 = vld [vmem:[#allocation7 + $0x28] sm:$0xff]  }
  0x36   :  { %502 = vmatpush3.bf16.msra.mxu0 %v570_v1  ;;  %522 = vmatpush3.bf16.msra.mxu1 %v578_v4  ;;  %v575_v9 = vld [vmem:[#allocation5 + $0x10] sm:$0xff]   ;;  %v581_v10 = vld [vmem:[#allocation7 + $0x20] sm:$0xff]   ;;  %v576_v11 = vld [vmem:[#allocation5 + $0x8] sm:$0xff]  }
  0x37   :  { %503 = vmatprep.subr.bf16.mxu0 %v712_v0  ;;  %523 = vmatprep.subr.bf16.mxu1 %v712_v0  ;;  %v582_v12 = vld [vmem:[#allocation7 + $0x18] sm:$0xff]   ;;  %v577_v13 = vld [vmem:[#allocation5] sm:$0xff]   ;;  %v583_v14 = vld [vmem:[#allocation7 + $0x10] sm:$0xff]  }
  0x38   :  { %v81_v15 = vld [vmem:[#allocation2] sm:$0xf]  ;;  %v584_v16 = vld [vmem:[#allocation7 + $0x8] sm:$0xff]   ;;  %v585_v17 = vld [vmem:[#allocation7] sm:$0xff]  }
  0x39   :  { %v586_v18 = vld [vmem:[#allocation8 + $0x38] sm:$0xff]   ;;  %v587_v19 = vld [vmem:[#allocation8 + $0x30] sm:$0xff]   ;;  %v588_v20 = vld [vmem:[#allocation8 + $0x28] sm:$0xff]  }
  0x3a   :  { %504 = vmatpush3.bf16.msra.mxu0 %v571_v2  ;;  %524 = vmatpush3.bf16.msra.mxu1 %v579_v6  ;;  %v589_v21 = vld [vmem:[#allocation8 + $0x20] sm:$0xff]   ;;  %v590_v22 = vld [vmem:[#allocation8 + $0x18] sm:$0xff]   ;;  %v591_v23 = vld [vmem:[#allocation8 + $0x10] sm:$0xff]  }
  0x3b   :  { %505 = vmatprep.subr.bf16.mxu0 %v712_v0  ;;  %525 = vmatprep.subr.bf16.mxu1 %v712_v0  ;;  %v447_v24 = vld [vmem:[%s820_s2] ss:$0 sm:$0xff]  ;;  %v592_v32 = vld [vmem:[#allocation8 + $0x8] sm:$0xff]   ;;  %v593_v33 = vld [vmem:[#allocation8] sm:$0xff]  }
  0x3c   :  { %v456_v34 = vld [vmem:[%s822_s4] ss:$0 sm:$0xff]  ;;  %s714_s4 = smov [#allocation10]  }
  0x3d   :  { %v465_v42 = vld [vmem:[%s824_s6] ss:$0 sm:$0xff]  ;;  %s436_s24 = sshll.u32 %s714_s4, 4  ;;  %s437_s24 = int_to_ptr.vmem [resolvable:$true] %s436_s24 }
  0x3e   :  { %506 = vmatpush3.bf16.msra.mxu0 %v572_v3  ;;  %526 = vmatpush3.bf16.msra.mxu1 %v580_v8  ;;  %s678_s6 = scalar_lea.vmem %s437_s24, 128  ;;  %p683_p7 = scmp.lt.s32.totalorder %s437_s24, %s437_s24 }
  0x3f   :  { %507 = vmatprep.subr.bf16.mxu0 %v712_v0  ;;  %527 = vmatprep.subr.bf16.mxu1 %v712_v0  ;;  %p679_p6 = scmp.ne.s32.totalorder %s437_s24, %s678_s6  ;;  %p684_p8 = scmp.lt.s32.totalorder %s678_s6, %s678_s6 }
  0x41   :  { %p685_p9 = por %p684_p8, %p683_p7 }
  0x42   :  { %508 = vmatpush3.bf16.msra.mxu0 %v573_v5  ;;  %528 = vmatpush3.bf16.msra.mxu1 %v581_v10 }
  0x43   :  { %509 = vmatprep.subr.bf16.mxu0 %v712_v0  ;;  %529 = vmatprep.subr.bf16.mxu1 %v712_v0  ;;  %p686_p10 = pnand %p685_p9, %p679_p6 }
  0x46   :  { %510 = vmatpush3.bf16.msra.mxu0 %v574_v7  ;;  %530 = vmatpush3.bf16.msra.mxu1 %v582_v12 }
  0x47   :  { %511 = vmatprep.subr.bf16.mxu0 %v712_v0  ;;  %531 = vmatprep.subr.bf16.mxu1 %v712_v0 }
  0x4a   :  { %512 = vmatpush3.bf16.msra.mxu0 %v575_v9  ;;  %532 = vmatpush3.bf16.msra.mxu1 %v583_v14 }
  0x4b   :  { %513 = vmatprep.subr.bf16.mxu0 %v712_v0  ;;  %533 = vmatprep.subr.bf16.mxu1 %v712_v0 }
  0x4e   :  { %514 = vmatpush3.bf16.msra.mxu0 %v576_v11  ;;  %534 = vmatpush3.bf16.msra.mxu1 %v584_v16 }
  0x4f   :  { %515 = vmatprep.subr.bf16.mxu0 %v712_v0  ;;  %535 = vmatprep.subr.bf16.mxu1 %v712_v0 }
  0x52   :  { %516 = vmatpush3.bf16.msra.mxu0 %v577_v13  ;;  %536 = vmatpush3.bf16.msra.mxu1 %v585_v17 }
  0x53   :  { %541 = vmatprep.subr.bf16.mxu0 %v712_v0 }
  0x55   :  { %518 = vmatmul.mubr.bf16.vlgmr.msra.gmra.mxu0 %v81_v15 }
  0x56   :  { %557 = vmatprep.mubr.msk.bf16.mxu0 %vm713_vm0, %v712_v0  ;;  %542 = vmatpush3.bf16.msra.mxu0 %v586_v18 }
  0x57   :  { %543 = vmatprep.subr.bf16.mxu0 %v712_v0 }
  0x5a   :  { %544 = vmatpush3.bf16.msra.mxu0 %v587_v19 }
  0x5b   :  { %545 = vmatprep.subr.bf16.mxu0 %v712_v0 }
  0x5e   :  { %546 = vmatpush3.bf16.msra.mxu0 %v588_v20 }
  0x5f   :  { %547 = vmatprep.subr.bf16.mxu0 %v712_v0 }
  0x62   :  { %548 = vmatpush3.bf16.msra.mxu0 %v589_v21 }
  0x63   :  { %549 = vmatprep.subr.bf16.mxu0 %v712_v0 }
  0x66   :  { %550 = vmatpush3.bf16.msra.mxu0 %v590_v22 }
  0x67   :  { %551 = vmatprep.subr.bf16.mxu0 %v712_v0 }
  0x6a   :  { %552 = vmatpush3.bf16.msra.mxu0 %v591_v23 }
  0x6b   :  { %553 = vmatprep.subr.bf16.mxu0 %v712_v0 }
  0x6e   :  { %554 = vmatpush3.bf16.msra.mxu0 %v592_v32 }
  0x6f   :  { %555 = vmatprep.subr.bf16.mxu0 %v712_v0 }
  0x72   :  { %556 = vmatpush3.bf16.msra.mxu0 %v593_v33 }
 0x115   :  { %v187_v25 = vpop.f32.mrf.mxu0 }
 0x116   :  { %v188_v26 = vadd.f32 %v447_v24, %v187_v25 }
 0x117   :  { %v519_v27 = vpop.f32.mrf.mxu0 }
 0x118   :  { %v193_v28 = vmax.f32 %v188_v26, 0.0 }
 0x119   :  { %v190_v29 = vpop.f32.mrf.mxu0 }
 0x11a   :  { %v194_v30 = vpack.c.bf16 %v193_v28, %v193_v28 }
 0x11b   :  { %v520_v31 = vpop.f32.mrf.mxu0 }
 0x11c   :  { %538 = vmatmul.mubr.bf16.vlgmr.msra.gmra.mxu1 %v194_v30 }
 0x1dc   :  { %v300_v35 = vpop.f32.mrf.mxu1 }
 0x1dd   :  { %v301_v36 = vadd.f32 %v456_v34, %v300_v35 }
 0x1de   :  { %v539_v37 = vpop.f32.mrf.mxu1 }
 0x1df   :  { %v306_v38 = vmax.f32 %v301_v36, 0.0 }
 0x1e0   :  { %v303_v39 = vpop.f32.mrf.mxu1 }
 0x1e1   :  { %v307_v40 = vpack.c.bf16 %v306_v38, %v306_v38 }
 0x1e2   :  { %v540_v41 = vpop.f32.mrf.mxu1 }
 0x1e3   :  { %558 = vmatmul.mubr.bf16.vlgmr.msra.gmra.mxu0 %v307_v40 }
 0x2a3   :  { %v413_v43 = vpop.f32.mrf.mxu0 }
 0x2a4   :  { %v414_v44 = vadd.f32 %v465_v42, %v413_v43 }
 0x2a5   :  { %v559_v45 = vpop.f32.mrf.mxu0 }
 0x2a6   :  { %v419_v46 = vand.u32 2147483647, %v414_v44  ;;  %vm423_vm1 = vcmp.ge.f32.partialorder %v414_v44, 0.0 }
 0x2a7   :  { %v416_v47 = vpop.f32.mrf.mxu0 }
 0x2a8   :  { %v420_v48 = vsub.f32 0.0, %v419_v46 }
 0x2a9   :  { %v560_v49 = vpop.f32.mrf.mxu0 }
 0x2aa   :  { %v421_v50 = vmul.f32 1.442695, %v420_v48 }
 0x2ac   :  { %594 = vpow2.f32 %v421_v50 }
 0x2b9   :  { %v595_v51 = vpop.eup %594 }
 0x2ba   :  { %v424_v52 = vadd.f32 1.0, %v595_v51 }
 0x2bc   :  { %596 = vrcp.f32 %v424_v52 }
 0x2c9   :  { %v597_v53 = vpop.eup %596 }
 0x2ca   :  { %v427_v54 = vmul.f32 %v597_v53, %v595_v51 }
 0x2cc   :  { %v428_v55 = vsel %vm423_vm1, %v597_v53, %v427_v54 }
 0x2cd   :  { %429 = vst [vmem:[#allocation10] sm:$0xff] %v428_v55 }
 0x2ce   :  { %689 = shalt.err (!%p686_p10)
}
 0x2cf   :  { %439 = dma.vmem_to_hbm [thread:$0]  %s437_s24, 128, %s825_s7, [#allocation4]  }
 0x2d0   :  { %704 = dma.done.wait [#allocation4], 128  }
 0x2d1   :  { %705 = vsyncadd [#allocation4], 4294967168 }
 0x2d2   :  { %443 = vsyncpa [#allocation3], 1 }
 0x2d3   :  { %444 = vsyncpa [#allocation6], 1 }
 0x2d4   :  { %445 = vsyncpa [#allocation9], 1 }
 0x2d5   :  { %446 = vsyncpa [#allocation4], 1 }

// kernel: tpu_custom_call.1
= control target key start
LH: loop header
LB: loop body
LE: loop exit
PB: predicated region body
PF: predicated region fallthrough
CT: control target
= control target key end

     0   :  { %12 = vsyncpa [#allocation3], 0  ;;  %s818_s0 = inlined_call_operand.hbm [shape: bf16[8,128], index: 0, kind: input, shape index: {}]   ;;  %s819_s1 = inlined_call_operand.hbm [shape: bf16[128,128], index: 1, kind: input, shape index: {}]   ;;  %s820_s2 = inlined_call_operand.vmem [shape: f32[1,128], index: 2, kind: input, shape index: {}]   ;;  %s821_s3 = inlined_call_operand.hbm [shape: bf16[128,128], index: 3, kind: input, shape index: {}]   ;;  %s822_s4 = inlined_call_operand.vmem [shape: f32[1,128], index: 4, kind: input, shape index: {}]   ;;  %s823_s5 = inlined_call_operand.hbm [shape: bf16[128,128], index: 5, kind: input, shape index: {}]   ;;  %s824_s6 = inlined_call_operand.vmem [shape: f32[1,128], index: 6, kind: input, shape index: {}]   ;;  %s825_s7 = inlined_call_operand.hbm [shape: f32[8,128], index: 7, kind: output, shape index: {}]  }
   0x1   :  { %13 = vsyncpa [#allocation6], 0 }
   0x2   :  { %14 = vsyncpa [#allocation9], 0 }
   0x3   :  { %15 = vsyncpa [#allocation4], 0  ;;  %s706_s24 = smov [#allocation5]  }
   0x4   :  { %s31_s25 = sshll.u32 %s706_s24, 4  ;;  %s32_s25 = int_to_ptr.vmem [resolvable:$true] %s31_s25 }
   0x5   :  { %s606_s26 = scalar_lea.vmem %s32_s25, 1024  ;;  %p611_p1 = scmp.lt.s32.totalorder %s32_s25, %s32_s25 }
   0x6   :  { %p607_p0 = scmp.ne.s32.totalorder %s32_s25, %s606_s26  ;;  %p612_p2 = scmp.lt.s32.totalorder %s606_s26, %s606_s26 }
   0x8   :  { %p613_p3 = por %p612_p2, %p611_p1 }
   0xa   :  { %p614_p4 = pnand %p613_p3, %p607_p0 }
   0xc   :  { %617 = shalt.err (!%p614_p4)
}
   0xd   :  { %s707_s27 = smov 64   ;;  %s708_s28 = smov 4  }
   0xe   :  { %37 = dma.hbm_to_vmem [thread:$0]  %s819_s1, 1024, %s32_s25, [#allocation6], %s707_s27, %s707_s27, %s708_s28  }
   0xf   :  { %s709_s8 = smov [#allocation2]   ;;  %s710_s10 = smov [#allocation7]  }
  0x10   :  { %s22_s9 = sshll.u32 %s709_s8, 4  ;;  %s45_s11 = sshll.u32 %s710_s10, 4  ;;  %s23_s9 = int_to_ptr.vmem [resolvable:$true] %s22_s9  ;;  %s46_s11 = int_to_ptr.vmem [resolvable:$true] %s45_s11 }
  0x11   :  { %s626_s12 = scalar_lea.vmem %s23_s9, 64  ;;  %p631_p6 = scmp.lt.s32.totalorder %s23_s9, %s23_s9 }
  0x12   :  { %p627_p5 = scmp.ne.s32.totalorder %s23_s9, %s626_s12  ;;  %p632_p7 = scmp.lt.s32.totalorder %s626_s12, %s626_s12 }
  0x14   :  { %p633_p8 = por %p632_p7, %p631_p6 }
  0x16   :  { %p634_p9 = pnand %p633_p8, %p627_p5 }
  0x18   :  { %637 = shalt.err (!%p634_p9)
}
  0x19   :  { %25 = dma.hbm_to_vmem [thread:$0]  %s818_s0, 64, %s23_s9, [#allocation3]  }
  0x1a   :  { %s646_s15 = scalar_lea.vmem %s46_s11, 1024  ;;  %p651_p11 = scmp.lt.s32.totalorder %s46_s11, %s46_s11 }
  0x1b   :  { %p647_p10 = scmp.ne.s32.totalorder %s46_s11, %s646_s15  ;;  %p652_p12 = scmp.lt.s32.totalorder %s646_s15, %s646_s15 }
  0x1d   :  { %p653_p13 = por %p652_p12, %p651_p11 }
  0x1f   :  { %p654_p0 = pnand %p653_p13, %p647_p10 }
  0x21   :  { %657 = shalt.err (!%p654_p0)
}
  0x22   :  { %51 = dma.hbm_to_vmem [thread:$0]  %s821_s3, 1024, %s46_s11, [#allocation6], %s707_s27, %s707_s27, %s708_s28  }
  0x23   :  { %s711_s17 = smov [#allocation8]  }
  0x24   :  { %s59_s18 = sshll.u32 %s711_s17, 4  ;;  %s60_s18 = int_to_ptr.vmem [resolvable:$true] %s59_s18 }
  0x25   :  { %s666_s19 = scalar_lea.vmem %s60_s18, 1024  ;;  %p671_p2 = scmp.lt.s32.totalorder %s60_s18, %s60_s18 }
  0x26   :  { %p667_p1 = scmp.ne.s32.totalorder %s60_s18, %s666_s19  ;;  %p672_p3 = scmp.lt.s32.totalorder %s666_s19, %s666_s19 }
  0x28   :  { %p673_p4 = por %p672_p3, %p671_p2 }
  0x2a   :  { %p674_p5 = pnand %p673_p4, %p667_p1 }
  0x2c   :  { %677 = shalt.err (!%p674_p5)
}
  0x2d   :  { %65 = dma.hbm_to_vmem [thread:$0]  %s823_s5, 1024, %s60_s18, [#allocation9], %s707_s27, %s707_s27, %s708_s28  }
  0x2e   :  { %698 = dma.done.wait [#allocation3], 64  }
  0x2f   :  { %699 = vsyncadd [#allocation3], 4294967232 }
  0x30   :  { %700 = dma.done.wait [#allocation6], 2048  }
  0x31   :  { %701 = vsyncadd [#allocation6], 4294965248 }
  0x32   :  { %702 = dma.done.wait [#allocation9], 1024  }
  0x33   :  { %703 = vsyncadd [#allocation9], 4294966272  ;;  %v712_v0 = vmov 0.0   ;;  %vm713_vm0 = vmmov 0   ;;  %v570_v1 = vld [vmem:[#allocation5 + $0x38] sm:$0xff]   ;;  %v571_v2 = vld [vmem:[#allocation5 + $0x30] sm:$0xff]  }
  0x34   :  { %501 = vmatprep.subr.bf16.mxu0 %v712_v0  ;;  %517 = vmatprep.mubr.msk.bf16.mxu0 %vm713_vm0, %v712_v0  ;;  %v572_v3 = vld [vmem:[#allocation5 + $0x28] sm:$0xff]   ;;  %v578_v4 = vld [vmem:[#allocation7 + $0x38] sm:$0xff]   ;;  %v573_v5 = vld [vmem:[#allocation5 + $0x20] sm:$0xff]  }
  0x35   :  { %521 = vmatprep.subr.bf16.mxu1 %v712_v0  ;;  %537 = vmatprep.mubr.msk.bf16.mxu1 %vm713_vm0, %v712_v0  ;;  %v579_v6 = vld [vmem:[#allocation7 + $0x30] sm:$0xff]   ;;  %v574_v7 = vld [vmem:[#allocation5 + $0x18] sm:$0xff]   ;;  %v580_v8 = vld [vmem:[#allocation7 + $0x28] sm:$0xff]  }
  0x36   :  { %502 = vmatpush3.bf16.msra.mxu0 %v570_v1  ;;  %522 = vmatpush3.bf16.msra.mxu1 %v578_v4  ;;  %v575_v9 = vld [vmem:[#allocation5 + $0x10] sm:$0xff]   ;;  %v581_v10 = vld [vmem:[#allocation7 + $0x20] sm:$0xff]   ;;  %v576_v11 = vld [vmem:[#allocation5 + $0x8] sm:$0xff]  }
  0x37   :  { %503 = vmatprep.subr.bf16.mxu0 %v712_v0  ;;  %523 = vmatprep.subr.bf16.mxu1 %v712_v0  ;;  %v582_v12 = vld [vmem:[#allocation7 + $0x18] sm:$0xff]   ;;  %v577_v13 = vld [vmem:[#allocation5] sm:$0xff]   ;;  %v583_v14 = vld [vmem:[#allocation7 + $0x10] sm:$0xff]  }
  0x38   :  { %v81_v15 = vld [vmem:[#allocation2] sm:$0xf]  ;;  %v584_v16 = vld [vmem:[#allocation7 + $0x8] sm:$0xff]   ;;  %v585_v17 = vld [vmem:[#allocation7] sm:$0xff]  }
  0x39   :  { %v586_v18 = vld [vmem:[#allocation8 + $0x38] sm:$0xff]   ;;  %v587_v19 = vld [vmem:[#allocation8 + $0x30] sm:$0xff]   ;;  %v588_v20 = vld [vmem:[#allocation8 + $0x28] sm:$0xff]  }
  0x3a   :  { %504 = vmatpush3.bf16.msra.mxu0 %v571_v2  ;;  %524 = vmatpush3.bf16.msra.mxu1 %v579_v6  ;;  %v589_v21 = vld [vmem:[#allocation8 + $0x20] sm:$0xff]   ;;  %v590_v22 = vld [vmem:[#allocation8 + $0x18] sm:$0xff]   ;;  %v591_v23 = vld [vmem:[#allocation8 + $0x10] sm:$0xff]  }
  0x3b   :  { %505 = vmatprep.subr.bf16.mxu0 %v712_v0  ;;  %525 = vmatprep.subr.bf16.mxu1 %v712_v0  ;;  %v447_v24 = vld [vmem:[%s820_s2] ss:$0 sm:$0xff]  ;;  %v592_v32 = vld [vmem:[#allocation8 + $0x8] sm:$0xff]   ;;  %v593_v33 = vld [vmem:[#allocation8] sm:$0xff]  }
  0x3c   :  { %v456_v34 = vld [vmem:[%s822_s4] ss:$0 sm:$0xff]  ;;  %s714_s4 = smov [#allocation10]  }
  0x3d   :  { %v465_v42 = vld [vmem:[%s824_s6] ss:$0 sm:$0xff]  ;;  %s436_s24 = sshll.u32 %s714_s4, 4  ;;  %s437_s24 = int_to_ptr.vmem [resolvable:$true] %s436_s24 }
  0x3e   :  { %506 = vmatpush3.bf16.msra.mxu0 %v572_v3  ;;  %526 = vmatpush3.bf16.msra.mxu1 %v580_v8  ;;  %s678_s6 = scalar_lea.vmem %s437_s24, 128  ;;  %p683_p7 = scmp.lt.s32.totalorder %s437_s24, %s437_s24 }
  0x3f   :  { %507 = vmatprep.subr.bf16.mxu0 %v712_v0  ;;  %527 = vmatprep.subr.bf16.mxu1 %v712_v0  ;;  %p679_p6 = scmp.ne.s32.totalorder %s437_s24, %s678_s6  ;;  %p684_p8 = scmp.lt.s32.totalorder %s678_s6, %s678_s6 }
  0x41   :  { %p685_p9 = por %p684_p8, %p683_p7 }
  0x42   :  { %508 = vmatpush3.bf16.msra.mxu0 %v573_v5  ;;  %528 = vmatpush3.bf16.msra.mxu1 %v581_v10 }
  0x43   :  { %509 = vmatprep.subr.bf16.mxu0 %v712_v0  ;;  %529 = vmatprep.subr.bf16.mxu1 %v712_v0  ;;  %p686_p10 = pnand %p685_p9, %p679_p6 }
  0x46   :  { %510 = vmatpush3.bf16.msra.mxu0 %v574_v7  ;;  %530 = vmatpush3.bf16.msra.mxu1 %v582_v12 }
  0x47   :  { %511 = vmatprep.subr.bf16.mxu0 %v712_v0  ;;  %531 = vmatprep.subr.bf16.mxu1 %v712_v0 }
  0x4a   :  { %512 = vmatpush3.bf16.msra.mxu0 %v575_v9  ;;  %532 = vmatpush3.bf16.msra.mxu1 %v583_v14 }
  0x4b   :  { %513 = vmatprep.subr.bf16.mxu0 %v712_v0  ;;  %533 = vmatprep.subr.bf16.mxu1 %v712_v0 }
  0x4e   :  { %514 = vmatpush3.bf16.msra.mxu0 %v576_v11  ;;  %534 = vmatpush3.bf16.msra.mxu1 %v584_v16 }
  0x4f   :  { %515 = vmatprep.subr.bf16.mxu0 %v712_v0  ;;  %535 = vmatprep.subr.bf16.mxu1 %v712_v0 }
  0x52   :  { %516 = vmatpush3.bf16.msra.mxu0 %v577_v13  ;;  %536 = vmatpush3.bf16.msra.mxu1 %v585_v17 }
  0x53   :  { %541 = vmatprep.subr.bf16.mxu0 %v712_v0 }
  0x55   :  { %518 = vmatmul.mubr.bf16.vlgmr.msra.gmra.mxu0 %v81_v15 }
  0x56   :  { %557 = vmatprep.mubr.msk.bf16.mxu0 %vm713_vm0, %v712_v0  ;;  %542 = vmatpush3.bf16.msra.mxu0 %v586_v18 }
  0x57   :  { %543 = vmatprep.subr.bf16.mxu0 %v712_v0 }
  0x5a   :  { %544 = vmatpush3.bf16.msra.mxu0 %v587_v19 }
  0x5b   :  { %545 = vmatprep.subr.bf16.mxu0 %v712_v0 }
  0x5e   :  { %546 = vmatpush3.bf16.msra.mxu0 %v588_v20 }
  0x5f   :  { %547 = vmatprep.subr.bf16.mxu0 %v712_v0 }
  0x62   :  { %548 = vmatpush3.bf16.msra.mxu0 %v589_v21 }
  0x63   :  { %549 = vmatprep.subr.bf16.mxu0 %v712_v0 }
  0x66   :  { %550 = vmatpush3.bf16.msra.mxu0 %v590_v22 }
  0x67   :  { %551 = vmatprep.subr.bf16.mxu0 %v712_v0 }
  0x6a   :  { %552 = vmatpush3.bf16.msra.mxu0 %v591_v23 }
  0x6b   :  { %553 = vmatprep.subr.bf16.mxu0 %v712_v0 }
  0x6e   :  { %554 = vmatpush3.bf16.msra.mxu0 %v592_v32 }
  0x6f   :  { %555 = vmatprep.subr.bf16.mxu0 %v712_v0 }
  0x72   :  { %556 = vmatpush3.bf16.msra.mxu0 %v593_v33 }
 0x115   :  { %v187_v25 = vpop.f32.mrf.mxu0 }
 0x116   :  { %v188_v26 = vadd.f32 %v447_v24, %v187_v25 }
 0x117   :  { %v519_v27 = vpop.f32.mrf.mxu0 }
 0x118   :  { %v193_v28 = vmax.f32 %v188_v26, 0.0 }
 0x119   :  { %v190_v29 = vpop.f32.mrf.mxu0 }
 0x11a   :  { %v194_v30 = vpack.c.bf16 %v193_v28, %v193_v28 }
 0x11b   :  { %v520_v31 = vpop.f32.mrf.mxu0 }
 0x11c   :  { %538 = vmatmul.mubr.bf16.vlgmr.msra.gmra.mxu1 %v194_v30 }
 0x1dc   :  { %v300_v35 = vpop.f32.mrf.mxu1 }
 0x1dd   :  { %v301_v36 = vadd.f32 %v456_v34, %v300_v35 }
 0x1de   :  { %v539_v37 = vpop.f32.mrf.mxu1 }
 0x1df   :  { %v306_v38 = vmax.f32 %v301_v36, 0.0 }
 0x1e0   :  { %v303_v39 = vpop.f32.mrf.mxu1 }
 0x1e1   :  { %v307_v40 = vpack.c.bf16 %v306_v38, %v306_v38 }
 0x1e2   :  { %v540_v41 = vpop.f32.mrf.mxu1 }
 0x1e3   :  { %558 = vmatmul.mubr.bf16.vlgmr.msra.gmra.mxu0 %v307_v40 }
 0x2a3   :  { %v413_v43 = vpop.f32.mrf.mxu0 }
 0x2a4   :  { %v414_v44 = vadd.f32 %v465_v42, %v413_v43 }
 0x2a5   :  { %v559_v45 = vpop.f32.mrf.mxu0 }
 0x2a6   :  { %v419_v46 = vand.u32 2147483647, %v414_v44  ;;  %vm423_vm1 = vcmp.ge.f32.partialorder %v414_v44, 0.0 }
 0x2a7   :  { %v416_v47 = vpop.f32.mrf.mxu0 }
 0x2a8   :  { %v420_v48 = vsub.f32 0.0, %v419_v46 }
 0x2a9   :  { %v560_v49 = vpop.f32.mrf.mxu0 }
 0x2aa   :  { %v421_v50 = vmul.f32 1.442695, %v420_v48 }
 0x2ac   :  { %594 = vpow2.f32 %v421_v50 }
 0x2b9   :  { %v595_v51 = vpop.eup %594 }
 0x2ba   :  { %v424_v52 = vadd.f32 1.0, %v595_v51 }
 0x2bc   :  { %596 = vrcp.f32 %v424_v52 }
 0x2c9   :  { %v597_v53 = vpop.eup %596 }
 0x2ca   :  { %v427_v54 = vmul.f32 %v597_v53, %v595_v51 }
 0x2cc   :  { %v428_v55 = vsel %vm423_vm1, %v597_v53, %v427_v54 }
 0x2cd   :  { %429 = vst [vmem:[#allocation10] sm:$0xff] %v428_v55 }
 0x2ce   :  { %689 = shalt.err (!%p686_p10)
}
 0x2cf   :  { %439 = dma.vmem_to_hbm [thread:$0]  %s437_s24, 128, %s825_s7, [#allocation4]  }
 0x2d0   :  { %704 = dma.done.wait [#allocation4], 128  }
 0x2d1   :  { %705 = vsyncadd [#allocation4], 4294967168 }
 0x2d2   :  { %443 = vsyncpa [#allocation3], 1 }
 0x2d3   :  { %444 = vsyncpa [#allocation6], 1 }
 0x2d4   :  { %445 = vsyncpa [#allocation9], 1 }
 0x2d5   :  { %446 = vsyncpa [#allocation4], 1 }

</bundles_post_ra>
